<compile_context>
chip_gen: v5e
topology: v5e:2x2
jax: 0.10.0
libtpu: 0.0.40
codegen_flags: <defaults>
</compile_context>

<pallas_src>
import math

import jax
import jax.numpy as jnp
from jax import lax
from jax.experimental import pallas as pl
from jax.experimental.pallas import tpu as pltpu


def _round_up(x, m):
    return (x + m - 1) // m * m


def _vmem_budget_bytes():
    """~3/4 of per-core VMEM: 128 MiB (v5e/v6e) -> 96 MiB, 64 MiB (v7x) -> 48 MiB."""
    try:
        cap = int(pltpu.get_tpu_info().vmem_capacity_bytes)
    except Exception:
        cap = 64 * 1024 * 1024  # conservative (v7x-sized) fallback
    return (cap * 3) // 4


def _make_linear_kernel(accumulate_in_output, compute_dtype):
    """Build the (i, j, k) grid-step kernel for y = x @ W^T + b."""

    def _tile_dot(x_ref, w_ref):
        a = x_ref[...]
        b = w_ref[...]
        if compute_dtype is not None:
            a = a.astype(compute_dtype)
            b = b.astype(compute_dtype)
        # (tm, tk) x (tn, tk) contracted on the last dims -> (tm, tn); the
        # PyTorch (out, in) weight tile is consumed directly (trans_b), no
        # materialized transpose in HBM.
        return lax.dot_general(
            a, b,
            dimension_numbers=(((1,), (1,)), ((), ())),
            preferred_element_type=jnp.float32,
        )

    if accumulate_in_output:
        # f32 output: the output block is resident across the K axis, so we
        # accumulate straight into it.  Bias is folded into the first K step,
        # which also makes grid_k == 1 a single write (no init, no epilogue).
        def kernel(x_ref, w_ref, b_ref, o_ref):
            k = pl.program_id(2)
            part = _tile_dot(x_ref, w_ref)

            @pl.when(k == 0)
            def _():
                o_ref[...] = part + b_ref[...]

            @pl.when(k > 0)
            def _():
                o_ref[...] += part

        return kernel

    # Low-precision output: accumulate in an f32 scratch, downcast once.
    def kernel(x_ref, w_ref, b_ref, o_ref, acc_ref):
        k = pl.program_id(2)
        part = _tile_dot(x_ref, w_ref)

        @pl.when(k == 0)
        def _():
            acc_ref[...] = part

        @pl.when(k > 0)
        def _():
            acc_ref[...] += part

        @pl.when(k == pl.num_programs(2) - 1)
        def _():
            o_ref[...] = (acc_ref[...] + b_ref[...]).astype(o_ref.dtype)

    return kernel


def linear_forward(x, weight, bias=None, *, precision="highest"):
    """y = x @ weight.T + bias   (PyTorch nn.Linear forward).

    x:      (..., K)  activations
    weight: (N, K)    PyTorch nn.Linear layout (out_features, in_features)
    bias:   (N,) or None
    precision: "highest" (full-precision MXU passes) or "bfloat16"
               (cast tiles to bf16 for the dot, keep f32 accumulation).
    """
    *lead, K = x.shape
    N, K_w = weight.shape
    assert K == K_w, (K, K_w)

    x2d = x.reshape(-1, K)
    M = x2d.shape[0]

    out_dtype = x.dtype  # nn.Linear keeps the activation dtype
    in_bytes = jnp.dtype(x.dtype).itemsize
    out_bytes = jnp.dtype(out_dtype).itemsize

    if bias is None:
        bias = jnp.zeros((N,), dtype=x.dtype)
    b2d = bias.reshape(1, N)

    accumulate_in_output = jnp.dtype(out_dtype) == jnp.dtype(jnp.float32)
    use_scratch = not accumulate_in_output

    # ---- tile selection (generation / dtype aware) -------------------------
    budget = _vmem_budget_bytes()
    if budget >= 80 * 1024 * 1024:       # 128 MiB VMEM parts (v5e / v6e)
        tm_t, tn_t, tk_t = 512, 1024, 1024
    else:                                # 64 MiB per-TC parts (v7x)
        tm_t, tn_t, tk_t = 512, 512, 1024
    # (targets are multiples of 256/128 and of the 8/16/32 sublane packing,
    #  so they are legal block dims for f32 / bf16 / int8 inputs alike)

    def vmem_est(tm, tn, tk):
        return (2 * (tm * tk + tn * tk + tn) * in_bytes   # double-buffered inputs
                + 2 * tm * tn * out_bytes                  # double-buffered output
                + (tm * tn * 4 if use_scratch else 0))     # f32 accumulator

    while vmem_est(tm_t, tn_t, tk_t) > budget:
        if tk_t > 512:
            tk_t //= 2
        elif tn_t > 256:
            tn_t //= 2
        elif tm_t > 256:
            tm_t //= 2
        else:
            break

    # Clamp blocks so they never exceed the (unpadded) array dims: either the
    # aligned target, or the full dim (always a legal block size).  Boundary
    # tiles use standard partial-block handling -> no wrapper-side M/N pad.
    tm = min(tm_t, M)
    tn = min(tn_t, N)

    # v7x: 2 TensorCores shard the "parallel" (i, j) axes.  For skinny-M
    # shapes that would otherwise give a single (i, j) block, split N into
    # >= 2 lane-aligned j blocks so both cores get work (harmless elsewhere).
    if pl.cdiv(M, tm) * pl.cdiv(N, tn) < 2 and N > 128:
        tn = max(128, _round_up(pl.cdiv(N, 2), 128))

    # K must be exact: garbage in a partial K block would corrupt real
    # outputs, so either take the whole K in one block or zero-pad K only.
    if K <= tk_t:
        tk = K
        K_p = K
    else:
        tk = tk_t
        K_p = _round_up(K, tk)
        if K_p != K:
            x2d = jnp.pad(x2d, ((0, 0), (0, K_p - K)))
            weight = jnp.pad(weight, ((0, 0), (0, K_p - K)))

    grid_i, grid_j, grid_k = pl.cdiv(M, tm), pl.cdiv(N, tn), K_p // tk
    grid = (grid_i, grid_j, grid_k)

    compute_dtype = jnp.bfloat16 if precision in ("bfloat16", "bf16") else None
    kernel = _make_linear_kernel(accumulate_in_output, compute_dtype)
    scratch_shapes = [] if accumulate_in_output else [pltpu.VMEM((tm, tn), jnp.float32)]

    # Scoped-VMEM limit follows the chosen tiles (2x headroom), capped by the
    # per-generation budget (no hard 48 MiB cap on 128 MiB parts).
    vmem_limit = int(min(budget, max(2 * vmem_est(tm, tn, tk), 16 * 1024 * 1024)))

    cost = pl.CostEstimate(
        flops=2 * M * N * K,
        bytes_accessed=int(
            grid_j * M * K_p * in_bytes        # x streamed once per j block
            + grid_i * N * K_p * in_bytes      # weight streamed once per i block
            + M * N * out_bytes                # output written once
            + grid_i * N * jnp.dtype(b2d.dtype).itemsize
        ),
        transcendentals=0,
    )

    out = pl.pallas_call(
        kernel,
        out_shape=jax.ShapeDtypeStruct((M, N), out_dtype),
        grid_spec=pltpu.PrefetchScalarGridSpec(
            num_scalar_prefetch=0,
            grid=grid,
            in_specs=[
                pl.BlockSpec((tm, tk), lambda i, j, k: (i, k)),   # x
                pl.BlockSpec((tn, tk), lambda i, j, k: (j, k)),   # weight (N, K)
                pl.BlockSpec((1, tn), lambda i, j, k: (0, j)),    # bias
            ],
            out_specs=pl.BlockSpec((tm, tn), lambda i, j, k: (i, j)),
            scratch_shapes=scratch_shapes,
        ),
        compiler_params=pltpu.CompilerParams(
            dimension_semantics=("parallel", "parallel", "arbitrary"),
            vmem_limit_bytes=vmem_limit,
        ),
        cost_estimate=cost,
    )(x2d, weight, b2d)

    return out.reshape(*lead, N)


def init_params(key, in_features, out_features, dtype=jnp.float32):
    """xavier_normal_ weight in PyTorch (out, in) layout and zero bias."""
    std = math.sqrt(2.0 / (in_features + out_features))
    w = jax.random.normal(key, (out_features, in_features), dtype=dtype) * std
    b = jnp.zeros((out_features,), dtype=dtype)
    return w, b


if __name__ == "__main__":
    key = jax.random.PRNGKey(0)
    kx1, kw1, kx2, kw2 = jax.random.split(key, 4)

    # --- small case (toy shapes matching the module) -------------------------
    batch, in_features, out_features = 8, 32, 64
    x = jax.random.normal(kx1, (batch, in_features), dtype=jnp.float32)
    weight, bias = init_params(kw1, in_features, out_features)

    out = jax.block_until_ready(linear_forward(x, weight, bias))
    ref = x @ weight.T + bias
    assert out.shape == (batch, out_features)
    assert jnp.allclose(out, ref, atol=1e-5, rtol=1e-5)

    # --- larger case: exercises the tiled (i, j, k) grid, in-output f32
    #     accumulation, first-step bias add, and partial boundary M/N blocks
    #     with no wrapper-side pad or output slice ----------------------------
    batch2, in2, out2 = 384, 1024, 640
    x2 = jax.random.normal(kx2, (batch2, in2), dtype=jnp.float32)
    weight2, bias2 = init_params(kw2, in2, out2)
    bias2 = bias2 + 0.5  # non-zero bias to verify the bias path

    out_big = jax.block_until_ready(linear_forward(x2, weight2, bias2))
    ref_big = x2 @ weight2.T + bias2
    assert out_big.shape == (batch2, out2)
    assert jnp.allclose(out_big, ref_big, atol=1e-4, rtol=1e-4)

    print("KERNEL_OK")
</pallas_src>

<mosaic_0001>
module attributes {stable_mosaic.version = 11 : i64} {
  func.func @kernel(%arg0: i32, %arg1: i32, %arg2: i32, %arg3: memref<8x32xf32, #tpu.memory_space<vmem>>, %arg4: memref<64x32xf32, #tpu.memory_space<vmem>>, %arg5: memref<1x64xf32, #tpu.memory_space<vmem>>, %arg6: memref<8x64xf32, #tpu.memory_space<vmem>>) attributes {dimension_semantics = [#tpu.dimension_semantics<parallel>, #tpu.dimension_semantics<parallel>, #tpu.dimension_semantics<arbitrary>], iteration_bounds = array<i64: 1, 1, 1>, scalar_prefetch = 0 : i64, scratch_operands = 0 : i64, tpu.core_type = #tpu.core_type<tc>, window_params = [{transform_indices = @transform_0, window_bounds = array<i64: 8, 32>}, {transform_indices = @transform_1, window_bounds = array<i64: 64, 32>}, {transform_indices = @transform_2, window_bounds = array<i64: 1, 64>}, {transform_indices = @transform_3, window_bounds = array<i64: 8, 64>}]} {
    %c0 = arith.constant 0 : index
    %c0_0 = arith.constant 0 : index
    %0 = vector.load %arg3[%c0, %c0_0] : memref<8x32xf32, #tpu.memory_space<vmem>>, vector<8x32xf32>
    %c0_1 = arith.constant 0 : index
    %c0_2 = arith.constant 0 : index
    %1 = vector.load %arg4[%c0_1, %c0_2] : memref<64x32xf32, #tpu.memory_space<vmem>>, vector<64x32xf32>
    %cst = arith.constant dense<0.000000e+00> : vector<8x64xf32>
    %2 = tpu.matmul %0, %1, %cst {dimension_numbers = #tpu.dot_dimension_numbers<[1], [1], [0], [0], [0, 0, 1, 0], [], []>} : vector<8x32xf32>, vector<64x32xf32>, vector<8x64xf32> -> vector<8x64xf32>
    %c0_i32 = arith.constant 0 : i32
    %3 = arith.cmpi eq, %arg2, %c0_i32 : i32
    %4 = arith.extui %3 : i1 to i32
    %c0_i32_3 = arith.constant 0 : i32
    %5 = arith.cmpi ne, %4, %c0_i32_3 : i32
    scf.if %5 {
      %c0_6 = arith.constant 0 : index
      %c0_7 = arith.constant 0 : index
      %9 = vector.load %arg5[%c0_6, %c0_7] : memref<1x64xf32, #tpu.memory_space<vmem>>, vector<1x64xf32>
      %10 = vector.broadcast %9 : vector<1x64xf32> to vector<8x64xf32>
      %11 = arith.addf %2, %10 : vector<8x64xf32>
      %c0_8 = arith.constant 0 : index
      %c0_9 = arith.constant 0 : index
      %12 = vector.load %arg6[%c0_8, %c0_9] : memref<8x64xf32, #tpu.memory_space<vmem>>, vector<8x64xf32>
      tpu.vector_store %arg6[%c0_8, %c0_9], %11 {strides = array<i32>} : memref<8x64xf32, #tpu.memory_space<vmem>>, vector<8x64xf32>,
    } else {
    }
    %c0_i32_4 = arith.constant 0 : i32
    %6 = arith.cmpi sgt, %arg2, %c0_i32_4 : i32
    %7 = arith.extui %6 : i1 to i32
    %c0_i32_5 = arith.constant 0 : i32
    %8 = arith.cmpi ne, %7, %c0_i32_5 : i32
    scf.if %8 {
      %c0_6 = arith.constant 0 : index
      %c0_7 = arith.constant 0 : index
      %9 = vector.load %arg6[%c0_6, %c0_7] : memref<8x64xf32, #tpu.memory_space<vmem>>, vector<8x64xf32>
      %10 = arith.addf %9, %2 : vector<8x64xf32>
      %c0_8 = arith.constant 0 : index
      %c0_9 = arith.constant 0 : index
      %11 = vector.load %arg6[%c0_8, %c0_9] : memref<8x64xf32, #tpu.memory_space<vmem>>, vector<8x64xf32>
      tpu.vector_store %arg6[%c0_8, %c0_9], %10 {strides = array<i32>} : memref<8x64xf32, #tpu.memory_space<vmem>>, vector<8x64xf32>,
    } else {
    }
    return
  }
  func.func @transform_0(%arg0: i32, %arg1: i32, %arg2: i32) -> (i32, i32) {
    %c0_i32 = arith.constant 0 : i32
    return %arg0, %arg2 : i32, i32
  }
  func.func @transform_1(%arg0: i32, %arg1: i32, %arg2: i32) -> (i32, i32) {
    %c0_i32 = arith.constant 0 : i32
    return %arg1, %arg2 : i32, i32
  }
  func.func @transform_2(%arg0: i32, %arg1: i32, %arg2: i32) -> (i32, i32) {
    %c0_i32 = arith.constant 0 : i32
    %c0_i32_0 = arith.constant 0 : i32
    return %c0_i32, %arg1 : i32, i32
  }
  func.func @transform_3(%arg0: i32, %arg1: i32, %arg2: i32) -> (i32, i32) {
    %c0_i32 = arith.constant 0 : i32
    return %arg0, %arg1 : i32, i32
  }
}

</mosaic_0001>

<bundles_post_ra>
// kernel: tpu_custom_call.1
= control target key start
LH: loop header
LB: loop body
LE: loop exit
PB: predicated region body
PF: predicated region fallthrough
CT: control target
= control target key end

     0   :  { %vm24_vm0 = vcmask 261120   ;;  %s207_s0 = inlined_call_operand.vmem [shape: f32[8,32], index: 0, kind: input, shape index: {}]   ;;  %s208_s1 = inlined_call_operand.vmem [shape: f32[64,32], index: 1, kind: input, shape index: {}]   ;;  %s209_s2 = inlined_call_operand.vmem [shape: f32[1,64], index: 2, kind: input, shape index: {}]   ;;  %s210_s3 = inlined_call_operand.hbm [shape: f32[8,64], index: 3, kind: output, shape index: {}]  }
   0x1   :  { %v23_v0 = vld [vmem:[%s208_s1 + $0x38] sm:$0xff]  ;;  %v22_v1 = vld [vmem:[%s208_s1 + $0x30] sm:$0xff] }
   0x2   :  { %107 = vmatpush.xpose.msk.msra.mxu0 %vm24_vm0, %v23_v0 }
   0x3   :  { %8 = vsyncpa [#allocation3], 0  ;;  %v21_v2 = vld [vmem:[%s208_s1 + $0x28] sm:$0xff]  ;;  %v20_v3 = vld [vmem:[%s208_s1 + $0x20] sm:$0xff]  ;;  %s144_s5 = smov [#allocation2]   ;;  %s98_s9 = sshll.u32 %s210_s3, 4  ;;  %s99_s9 = int_to_ptr.hbm [resolvable:$true] %s98_s9 }
   0x4   :  { %v19_v4 = vld [vmem:[%s208_s1 + $0x18] sm:$0xff]  ;;  %v18_v5 = vld [vmem:[%s208_s1 + $0x10] sm:$0xff]  ;;  %v17_v6 = vld [vmem:[%s208_s1 + $0x8] sm:$0xff]  ;;  %s96_s6 = sshll.u32 %s144_s5, 4  ;;  %vm81_vm1 = vcmask 523264   ;;  %s97_s6 = int_to_ptr.vmem [resolvable:$true] %s96_s6 }
   0x5   :  { %v16_v7 = vld [vmem:[%s208_s1] sm:$0xff] }
   0x6   :  { %108 = vmatpush.xpose.msk.msra.mxu0 %vm24_vm0, %v22_v1  ;;  %v15_v8 = vld [vmem:[%s207_s0] sm:$0xff] }
   0x7   :  { %v117_v9 = vld [vmem:[%s209_s2] ss:$0 sm:$0xff] }
   0xa   :  { %109 = vmatpush.xpose.msk.msra.mxu0 %vm24_vm0, %v21_v2 }
   0xe   :  { %110 = vmatpush.xpose.msk.msra.mxu0 %vm24_vm0, %v20_v3 }
  0x12   :  { %111 = vmatpush.xpose.msk.msra.mxu0 %vm24_vm0, %v19_v4 }
  0x16   :  { %112 = vmatpush.xpose.msk.msra.mxu0 %vm24_vm0, %v18_v5 }
  0x1a   :  { %113 = vmatpush.xpose.msk.msra.mxu0 %vm24_vm0, %v17_v6 }
  0x1e   :  { %114 = vmatpush.xpose.msk.msra.mxu0 %vm24_vm0, %v16_v7 }
  0x21   :  { %115 = vmatmul.msk.f32.vlgmr.msra.gmra.mxu0 %vm24_vm0, %v15_v8 }
  0x9e   :  { %v69_v10 = vpop.f32.mrf.mxu0 }
  0x9f   :  { %v80_v11 = vadd.f32 %v117_v9, %v69_v10 }
  0xa1   :  { %82 = vst.msk [vmem:[#allocation2] sm:$0xff] %vm81_vm1, %v80_v11 }
  0xa2   :  { %101 = dma.vmem_to_hbm [thread:$0]  %s97_s6, 128, %s99_s9, [#allocation3]  }
  0xa3   :  { %142 = dma.done.wait [#allocation3], 128  }
  0xa4   :  { %143 = vsyncadd [#allocation3], 4294967168 }
  0xa5   :  { %106 = vsyncpa [#allocation3], 1 }

</bundles_post_ra>
